<compile_context>
chip_gen: v6e
topology: v6e:2x2x1
jax: 0.10.0
libtpu: 0.0.40
codegen_flags: <defaults>
</compile_context>

<pallas_src>
import functools

import jax
import jax.numpy as jnp
import numpy as np
from jax.experimental import pallas as pl
from jax.experimental.pallas import tpu as pltpu


def _round_up(a, b):
    return ((a + b - 1) // b) * b


# ---------------------------------------------------------------------------
# Pallas kernel 1: single-block GEMM + bias (+ optional ReLU).
# Used for the Condition-net convs (via im2col) and the fused Linear bank.
# ---------------------------------------------------------------------------
def _gemm_bias_kernel(x_ref, w_ref, b_ref, o_ref, *, relu):
    acc = jnp.dot(x_ref[...], w_ref[...], preferred_element_type=jnp.float32)
    acc = acc + b_ref[...]
    if relu:
        acc = jnp.maximum(acc, 0.0)
    o_ref[...] = acc.astype(o_ref.dtype)


def pallas_gemm_bias(x, w, b, *, relu=False):
    """x: (M, K), w: (K, N), b: (N,) -> (M, N).  Shapes here are tiny, so a
    single full-block grid step is used (full-dim blocks satisfy the (8,128)
    rule via the full-extent exception)."""
    M, K = x.shape
    Kw, Nc = w.shape
    assert K == Kw
    b2 = b.reshape(1, Nc).astype(jnp.float32)
    return pl.pallas_call(
        functools.partial(_gemm_bias_kernel, relu=relu),
        out_shape=jax.ShapeDtypeStruct((M, Nc), jnp.float32),
        grid=(1,),
        in_specs=[
            pl.BlockSpec((M, K), lambda i: (0, 0)),
            pl.BlockSpec((K, Nc), lambda i: (0, 0)),
            pl.BlockSpec((1, Nc), lambda i: (0, 0)),
        ],
        out_specs=pl.BlockSpec((M, Nc), lambda i: (0, 0)),
    )(x.astype(jnp.float32), w.astype(jnp.float32), b2)


# ---------------------------------------------------------------------------
# Pallas kernel 2: fused main branch
#   h1 = relu((x @ W1 + b1) * s1 + t1)
#   h2 = relu((h1 @ W2 + b2) * s2 + t2)
#   y  =      (h2 @ W3 + b3) * s3 + t3
# with s = 1 + scale (folding the residual "... + out" of the PyTorch module).
# ---------------------------------------------------------------------------
def _harmonizer_kernel(x_ref, w1_ref, b1_ref, w2_ref, b2_ref, w3_ref, b3_ref,
                       s1_ref, t1_ref, s2_ref, t2_ref, s3_ref, t3_ref, o_ref):
    x = x_ref[0]                                                    # (TH, Cin)
    h = jnp.dot(x, w1_ref[...], preferred_element_type=jnp.float32) + b1_ref[...]
    h = jnp.maximum(h * s1_ref[0] + t1_ref[0], 0.0)
    h = jnp.dot(h, w2_ref[...], preferred_element_type=jnp.float32) + b2_ref[...]
    h = jnp.maximum(h * s2_ref[0] + t2_ref[0], 0.0)
    h = jnp.dot(h, w3_ref[...], preferred_element_type=jnp.float32) + b3_ref[...]
    o_ref[0, :, :] = (h * s3_ref[0] + t3_ref[0]).astype(o_ref.dtype)


def fused_main_branch(x_nhwc_flat, w1, b1, w2, b2, w3, b3,
                      s1p, t1, s2p, t2, s3p, t3, *, tile_hw=512):
    """x_nhwc_flat: (N, HW, Cin); s*/t*: per-sample (N, 1, C).  Returns (N, HW, Cout)."""
    N, HW, Cin = x_nhwc_flat.shape
    Cmid = w1.shape[1]
    Cout = w3.shape[1]

    TH = min(tile_hw, _round_up(HW, 8))
    HWp = _round_up(HW, TH)
    if HWp != HW:
        x_nhwc_flat = jnp.pad(x_nhwc_flat, ((0, 0), (0, HWp - HW), (0, 0)))
    m_tiles = HWp // TH

    def row(v):
        return v.reshape(1, -1).astype(jnp.float32)

    out = pl.pallas_call(
        _harmonizer_kernel,
        out_shape=jax.ShapeDtypeStruct((N, HWp, Cout), jnp.float32),
        grid=(N, m_tiles),
        in_specs=[
            pl.BlockSpec((1, TH, Cin), lambda n, m: (n, m, 0)),     # x tile
            pl.BlockSpec((Cin, Cmid), lambda n, m: (0, 0)),         # W1
            pl.BlockSpec((1, Cmid), lambda n, m: (0, 0)),           # b1
            pl.BlockSpec((Cmid, Cmid), lambda n, m: (0, 0)),        # W2
            pl.BlockSpec((1, Cmid), lambda n, m: (0, 0)),           # b2
            pl.BlockSpec((Cmid, Cout), lambda n, m: (0, 0)),        # W3
            pl.BlockSpec((1, Cout), lambda n, m: (0, 0)),           # b3
            pl.BlockSpec((1, 1, Cmid), lambda n, m: (n, 0, 0)),     # 1 + scale1
            pl.BlockSpec((1, 1, Cmid), lambda n, m: (n, 0, 0)),     # shift1
            pl.BlockSpec((1, 1, Cmid), lambda n, m: (n, 0, 0)),     # 1 + scale2
            pl.BlockSpec((1, 1, Cmid), lambda n, m: (n, 0, 0)),     # shift2
            pl.BlockSpec((1, 1, Cout), lambda n, m: (n, 0, 0)),     # 1 + scale3
            pl.BlockSpec((1, 1, Cout), lambda n, m: (n, 0, 0)),     # shift3
        ],
        out_specs=pl.BlockSpec((1, TH, Cout), lambda n, m: (n, m, 0)),
        compiler_params=pltpu.CompilerParams(
            dimension_semantics=("parallel", "parallel")),
    )(x_nhwc_flat.astype(jnp.float32),
      w1.astype(jnp.float32), row(b1),
      w2.astype(jnp.float32), row(b2),
      w3.astype(jnp.float32), row(b3),
      s1p.astype(jnp.float32), t1.astype(jnp.float32),
      s2p.astype(jnp.float32), t2.astype(jnp.float32),
      s3p.astype(jnp.float32), t3.astype(jnp.float32))
    return out[:, :HW, :]


# ---------------------------------------------------------------------------
# im2col (pure data rearrangement for the tiny Condition-net convs)
# ---------------------------------------------------------------------------
def _im2col(x_nchw, kh, kw, stride, padding):
    N, C, H, W = x_nchw.shape
    xp = jnp.pad(x_nchw, ((0, 0), (0, 0), (padding, padding), (padding, padding)))
    Hp, Wp = H + 2 * padding, W + 2 * padding
    OH = (Hp - kh) // stride + 1
    OW = (Wp - kw) // stride + 1
    cols = []
    for i in range(kh):
        for j in range(kw):
            sl = xp[:, :, i: i + (OH - 1) * stride + 1: stride,
                          j: j + (OW - 1) * stride + 1: stride]
            cols.append(sl)                                  # (N, C, OH, OW)
    p = jnp.stack(cols, axis=2)                              # (N, C, KH*KW, OH, OW)
    p = p.reshape(N, C * kh * kw, OH, OW)                    # idx = c*(kh*kw)+i*kw+j
    p = p.transpose(0, 2, 3, 1).reshape(N * OH * OW, C * kh * kw)
    return p, OH, OW


def conv2d_relu_pallas(x_nchw, weight_oihw, bias, stride, padding, *, relu):
    Co, Ci, kh, kw = weight_oihw.shape
    N = x_nchw.shape[0]
    patches, OH, OW = _im2col(x_nchw, kh, kw, stride, padding)
    w_mat = weight_oihw.reshape(Co, Ci * kh * kw).T          # (K, Co)
    out = pallas_gemm_bias(patches, w_mat, bias, relu=relu)  # (N*OH*OW, Co)
    return out.reshape(N, OH, OW, Co)


def condition_forward(x_nchw, p):
    """ZeroPad2d(1) + strided convs + ReLU, then spatial mean -> (N, cond_nf)."""
    h = conv2d_relu_pallas(x_nchw, p["cw1"], p["cb1"], 2, 1, relu=True)
    h = conv2d_relu_pallas(h.transpose(0, 3, 1, 2), p["cw2"], p["cb2"], 2, 1, relu=True)
    h = conv2d_relu_pallas(h.transpose(0, 3, 1, 2), p["cw3"], p["cb3"], 2, 1, relu=True)
    # TODO(synk): spatial mean is plain-JAX data reduction (trivial size).
    return jnp.mean(h, axis=(1, 2))


# ---------------------------------------------------------------------------
# ScaleHarmonizer module
# ---------------------------------------------------------------------------
def _init_params(key, in_nc, out_nc, base_nf, cond_nf):
    ks = jax.random.split(key, 24)
    it = iter(range(24))

    def nrm(shape, scale):
        return scale * jax.random.normal(ks[next(it)], shape, jnp.float32)

    p = {}
    p["cw1"] = nrm((cond_nf, in_nc, 7, 7), 1.0 / np.sqrt(in_nc * 49))
    p["cb1"] = nrm((cond_nf,), 0.1)
    p["cw2"] = nrm((cond_nf, cond_nf, 3, 3), 1.0 / np.sqrt(cond_nf * 9))
    p["cb2"] = nrm((cond_nf,), 0.1)
    p["cw3"] = nrm((cond_nf, cond_nf, 3, 3), 1.0 / np.sqrt(cond_nf * 9))
    p["cb3"] = nrm((cond_nf,), 0.1)
    p["ls1w"] = nrm((base_nf, cond_nf), 1.0 / np.sqrt(cond_nf)); p["ls1b"] = nrm((base_nf,), 0.1)
    p["lt1w"] = nrm((base_nf, cond_nf), 1.0 / np.sqrt(cond_nf)); p["lt1b"] = nrm((base_nf,), 0.1)
    p["ls2w"] = nrm((base_nf, cond_nf), 1.0 / np.sqrt(cond_nf)); p["ls2b"] = nrm((base_nf,), 0.1)
    p["lt2w"] = nrm((base_nf, cond_nf), 1.0 / np.sqrt(cond_nf)); p["lt2b"] = nrm((base_nf,), 0.1)
    p["ls3w"] = nrm((out_nc, cond_nf), 1.0 / np.sqrt(cond_nf)); p["ls3b"] = nrm((out_nc,), 0.1)
    p["lt3w"] = nrm((out_nc, cond_nf), 1.0 / np.sqrt(cond_nf)); p["lt3b"] = nrm((out_nc,), 0.1)
    p["w1"] = nrm((base_nf, in_nc, 1, 1), 1.0 / np.sqrt(in_nc)); p["b1"] = nrm((base_nf,), 0.1)
    p["w2"] = nrm((base_nf, base_nf, 1, 1), 1.0 / np.sqrt(base_nf)); p["b2"] = nrm((base_nf,), 0.1)
    p["w3"] = nrm((out_nc, base_nf, 1, 1), 1.0 / np.sqrt(base_nf)); p["b3"] = nrm((out_nc,), 0.1)
    return p


class ScaleHarmonizerPallas:
    def __init__(self, in_nc=6, out_nc=3, base_nf=64, cond_nf=32, key=None):
        self.in_nc, self.out_nc = in_nc, out_nc
        self.base_nf, self.cond_nf = base_nf, cond_nf
        key = jax.random.PRNGKey(0) if key is None else key
        self.params = _init_params(key, in_nc, out_nc, base_nf, cond_nf)

    def __call__(self, x_nchw):
        p = self.params
        N, C, H, W = x_nchw.shape
        bnf, onc = self.base_nf, self.out_nc

        cond = condition_forward(x_nchw, p)                         # (N, cond_nf)

        # Fused bank of 6 Linear layers: one GEMM over concatenated weights.
        w_cat = jnp.concatenate(
            [p["ls1w"].T, p["lt1w"].T, p["ls2w"].T, p["lt2w"].T,
             p["ls3w"].T, p["lt3w"].T], axis=1)                     # (cond_nf, 4*bnf+2*onc)
        b_cat = jnp.concatenate(
            [p["ls1b"], p["lt1b"], p["ls2b"], p["lt2b"], p["ls3b"], p["lt3b"]])
        lin = pallas_gemm_bias(cond, w_cat, b_cat, relu=False)
        o = 0
        scale1 = lin[:, o:o + bnf]; o += bnf
        shift1 = lin[:, o:o + bnf]; o += bnf
        scale2 = lin[:, o:o + bnf]; o += bnf
        shift2 = lin[:, o:o + bnf]; o += bnf
        scale3 = lin[:, o:o + onc]; o += onc
        shift3 = lin[:, o:o + onc]

        # Main branch: NHWC-flattened pixels, all three 1x1 convs + FiLM fused.
        x_flat = x_nchw.transpose(0, 2, 3, 1).reshape(N, H * W, C)
        w1 = p["w1"].reshape(bnf, C).T                              # (C, bnf)
        w2 = p["w2"].reshape(bnf, bnf).T
        w3 = p["w3"].reshape(onc, bnf).T
        out = fused_main_branch(
            x_flat, w1, p["b1"], w2, p["b2"], w3, p["b3"],
            (1.0 + scale1)[:, None, :], shift1[:, None, :],
            (1.0 + scale2)[:, None, :], shift2[:, None, :],
            (1.0 + scale3)[:, None, :], shift3[:, None, :])
        # TODO(synk): keep NHWC if downstream accepts it to skip this transpose.
        return out.reshape(N, H, W, onc).transpose(0, 3, 1, 2)


# ---------------------------------------------------------------------------
# Pure-JAX reference (same math as the PyTorch module) + main
# ---------------------------------------------------------------------------
def reference_forward(x, p):
    def conv(h, w, b, stride, pad):
        y = jax.lax.conv_general_dilated(
            h, w, (stride, stride), [(pad, pad), (pad, pad)],
            dimension_numbers=("NCHW", "OIHW", "NCHW"))
        return y + b[None, :, None, None]

    c = jax.nn.relu(conv(x, p["cw1"], p["cb1"], 2, 1))
    c = jax.nn.relu(conv(c, p["cw2"], p["cb2"], 2, 1))
    c = jax.nn.relu(conv(c, p["cw3"], p["cb3"], 2, 1))
    cond = jnp.mean(c, axis=(2, 3))

    def lin(v, w, b):
        return v @ w.T + b

    scale1 = lin(cond, p["ls1w"], p["ls1b"]); shift1 = lin(cond, p["lt1w"], p["lt1b"])
    scale2 = lin(cond, p["ls2w"], p["ls2b"]); shift2 = lin(cond, p["lt2w"], p["lt2b"])
    scale3 = lin(cond, p["ls3w"], p["ls3b"]); shift3 = lin(cond, p["lt3w"], p["lt3b"])

    out = conv(x, p["w1"], p["b1"], 1, 0)
    out = out * scale1[:, :, None, None] + shift1[:, :, None, None] + out
    out = jax.nn.relu(out)
    out = conv(out, p["w2"], p["b2"], 1, 0)
    out = out * scale2[:, :, None, None] + shift2[:, :, None, None] + out
    out = jax.nn.relu(out)
    out = conv(out, p["w3"], p["b3"], 1, 0)
    out = out * scale3[:, :, None, None] + shift3[:, :, None, None] + out
    return out


if __name__ == "__main__":
    key = jax.random.PRNGKey(0)
    kx, kp = jax.random.split(key)

    N, in_nc, H, W = 2, 6, 16, 16
    out_nc, base_nf, cond_nf = 3, 64, 32

    x = jax.random.normal(kx, (N, in_nc, H, W), jnp.float32)

    mod = ScaleHarmonizerPallas(in_nc, out_nc, base_nf, cond_nf, key=kp)
    out = jax.block_until_ready(mod(x))

    ref = jax.block_until_ready(reference_forward(x, mod.params))

    assert out.shape == ref.shape == (N, out_nc, H, W), (out.shape, ref.shape)
    np.testing.assert_allclose(np.asarray(out), np.asarray(ref),
                               rtol=2e-3, atol=2e-3)
    print("KERNEL_OK")
</pallas_src>

<mosaic_0001>
module attributes {stable_mosaic.version = 11 : i64} {
  func.func @_gemm_bias_kernel(%arg0: i32, %arg1: memref<72x294xf32, #tpu.memory_space<vmem>>, %arg2: memref<294x32xf32, #tpu.memory_space<vmem>>, %arg3: memref<1x32xf32, #tpu.memory_space<vmem>>, %arg4: memref<72x32xf32, #tpu.memory_space<vmem>>) attributes {dimension_semantics = [#tpu.dimension_semantics<arbitrary>], iteration_bounds = array<i64: 1>, scalar_prefetch = 0 : i64, scratch_operands = 0 : i64, tpu.core_type = #tpu.core_type<tc>, window_params = [{pipeline_mode = #tpu.pipeline_mode<synchronous>, transform_indices = @transform_0, window_bounds = array<i64: 72, 294>}, {pipeline_mode = #tpu.pipeline_mode<synchronous>, transform_indices = @transform_1, window_bounds = array<i64: 294, 32>}, {pipeline_mode = #tpu.pipeline_mode<synchronous>, transform_indices = @transform_2, window_bounds = array<i64: 1, 32>}, {pipeline_mode = #tpu.pipeline_mode<synchronous>, transform_indices = @transform_3, window_bounds = array<i64: 72, 32>}]} {
    %c0 = arith.constant 0 : index
    %c0_0 = arith.constant 0 : index
    %0 = vector.load %arg1[%c0, %c0_0] : memref<72x294xf32, #tpu.memory_space<vmem>>, vector<72x294xf32>
    %c0_1 = arith.constant 0 : index
    %c0_2 = arith.constant 0 : index
    %1 = vector.load %arg2[%c0_1, %c0_2] : memref<294x32xf32, #tpu.memory_space<vmem>>, vector<294x32xf32>
    %cst = arith.constant dense<0.000000e+00> : vector<72x32xf32>
    %2 = tpu.matmul %0, %1, %cst {dimension_numbers = #tpu.dot_dimension_numbers<[1], [0], [0], [1], [0, 0, 1, 1], [], []>} : vector<72x294xf32>, vector<294x32xf32>, vector<72x32xf32> -> vector<72x32xf32>
    %c0_3 = arith.constant 0 : index
    %c0_4 = arith.constant 0 : index
    %3 = vector.load %arg3[%c0_3, %c0_4] : memref<1x32xf32, #tpu.memory_space<vmem>>, vector<1x32xf32>
    %4 = vector.broadcast %3 : vector<1x32xf32> to vector<72x32xf32>
    %5 = arith.addf %2, %4 : vector<72x32xf32>
    %cst_5 = arith.constant 0.000000e+00 : f32
    %6 = vector.broadcast %cst_5 : f32 to vector<72x32xf32>
    %7 = arith.maximumf %5, %6 : vector<72x32xf32>
    %c0_6 = arith.constant 0 : index
    %c0_7 = arith.constant 0 : index
    %8 = vector.load %arg4[%c0_6, %c0_7] : memref<72x32xf32, #tpu.memory_space<vmem>>, vector<72x32xf32>
    tpu.vector_store %arg4[%c0_6, %c0_7], %7 {strides = array<i32>} : memref<72x32xf32, #tpu.memory_space<vmem>>, vector<72x32xf32>,
    return
  }
  func.func @transform_0(%arg0: i32) -> (i32, i32) {
    %c0_i32 = arith.constant 0 : i32
    %c0_i32_0 = arith.constant 0 : i32
    %c0_i32_1 = arith.constant 0 : i32
    return %c0_i32, %c0_i32_0 : i32, i32
  }
  func.func @transform_1(%arg0: i32) -> (i32, i32) {
    %c0_i32 = arith.constant 0 : i32
    %c0_i32_0 = arith.constant 0 : i32
    %c0_i32_1 = arith.constant 0 : i32
    return %c0_i32, %c0_i32_0 : i32, i32
  }
  func.func @transform_2(%arg0: i32) -> (i32, i32) {
    %c0_i32 = arith.constant 0 : i32
    %c0_i32_0 = arith.constant 0 : i32
    %c0_i32_1 = arith.constant 0 : i32
    return %c0_i32, %c0_i32_0 : i32, i32
  }
  func.func @transform_3(%arg0: i32) -> (i32, i32) {
    %c0_i32 = arith.constant 0 : i32
    %c0_i32_0 = arith.constant 0 : i32
    %c0_i32_1 = arith.constant 0 : i32
    return %c0_i32, %c0_i32_0 : i32, i32
  }
}

</mosaic_0001>

<bundles_post_ra>
// kernel: tpu_custom_call.1
= control target key start
LH: loop header
LB: loop body
LE: loop exit
PB: predicated region body
PF: predicated region fallthrough
CT: control target
= control target key end

     0   :  { %v483_v3 = vmov 0.0   ;;  %vm484_vm0 = vmmov 0   ;;  %vm113_vm1 = vcmask 1045504   ;;  %vm85_vm2 = vcmask 310272   ;;  %s779_s1 = inlined_call_operand.vmem [shape: f32[294,32], index: 1, kind: input, shape index: {}]   ;;  %s780_s0 = inlined_call_operand.vmem [shape: f32[72,294], index: 0, kind: input, shape index: {}]   ;;  %s781_s2 = inlined_call_operand.vmem [shape: f32[1,32], index: 2, kind: input, shape index: {}]   ;;  %s782_s3 = inlined_call_operand.vmem [shape: f32[72,32], index: 3, kind: output, shape index: {}]  }
   0x1   :  { %v72_v0 = vld [vmem:[%s779_s1 + $0xf8] sm:$0xff]  ;;  %v71_v2 = vld [vmem:[%s779_s1 + $0xf0] sm:$0xff]  ;;  %444 = vmatprep.subr.mxu1 %v483_v3  ;;  %454 = vmatprep.mubr.msk.f32.mxu1 %vm484_vm0, %v483_v3  ;;  %v70_v5 = vld [vmem:[%s779_s1 + $0xe8] sm:$0xff]  ;;  %vm346_vm3 = vcmask 261120  }
   0x2   :  { %v56_v1 = vld [vmem:[%s779_s1 + $0x78] sm:$0xff]  ;;  %371 = vmatprep.subr.mxu0 %v72_v0  ;;  %v55_v4 = vld [vmem:[%s779_s1 + $0x70] sm:$0xff]  ;;  %v54_v6 = vld [vmem:[%s779_s1 + $0x68] sm:$0xff] }
   0x3   :  { %372 = vmatpush3.msra.mxu0 %v56_v1  ;;  %v69_v7 = vld [vmem:[%s779_s1 + $0xe0] sm:$0xff]  ;;  %v68_v9 = vld [vmem:[%s779_s1 + $0xd8] sm:$0xff]  ;;  %v67_v11 = vld [vmem:[%s779_s1 + $0xd0] sm:$0xff] }
   0x4   :  { %373 = vmatprep.subr.mxu0 %v71_v2  ;;  %v53_v8 = vld [vmem:[%s779_s1 + $0x60] sm:$0xff]  ;;  %v52_v10 = vld [vmem:[%s779_s1 + $0x58] sm:$0xff]  ;;  %v51_v12 = vld [vmem:[%s779_s1 + $0x50] sm:$0xff] }
   0x5   :  { %374 = vmatpush3.msra.mxu0 %v55_v4  ;;  %v77_v13 = vld [vmem:[%s779_s1 + $0x120] sm:$0x3f]  ;;  %v66_v14 = vld [vmem:[%s779_s1 + $0xc8] sm:$0xff]  ;;  %v76_v15 = vld [vmem:[%s779_s1 + $0x118] sm:$0xff] }
   0x6   :  { %375 = vmatprep.subr.mxu0 %v70_v5  ;;  %445 = vmatpush3.msk.msra.mxu1 %vm113_vm1, %v77_v13  ;;  %v50_v16 = vld [vmem:[%s779_s1 + $0x48] sm:$0xff]  ;;  %v65_v18 = vld [vmem:[%s779_s1 + $0xc0] sm:$0xff]  ;;  %v75_v19 = vld [vmem:[%s779_s1 + $0x110] sm:$0xff] }
   0x7   :  { %376 = vmatpush3.msra.mxu0 %v54_v6  ;;  %446 = vmatprep.subr.mxu1 %v483_v3  ;;  %v15_v17 = vld [vmem:[%s780_s0 + $0x8] sm:$0xff]  ;;  %v49_v20 = vld [vmem:[%s779_s1 + $0x40] sm:$0xff]  ;;  %v64_v21 = vld [vmem:[%s779_s1 + $0xb8] sm:$0xff] }
   0x8   :  { %377 = vmatprep.subr.mxu0 %v69_v7  ;;  %447 = vmatpush3.msra.mxu1 %v76_v15  ;;  %v74_v22 = vld [vmem:[%s779_s1 + $0x108] sm:$0xff]  ;;  %v48_v23 = vld [vmem:[%s779_s1 + $0x38] sm:$0xff]  ;;  %v63_v24 = vld [vmem:[%s779_s1 + $0xb0] sm:$0xff] }
   0x9   :  { %378 = vmatpush3.msra.mxu0 %v53_v8  ;;  %448 = vmatprep.subr.mxu1 %v483_v3  ;;  %v73_v25 = vld [vmem:[%s779_s1 + $0x100] sm:$0xff]  ;;  %v47_v26 = vld [vmem:[%s779_s1 + $0x30] sm:$0xff]  ;;  %v62_v28 = vld [vmem:[%s779_s1 + $0xa8] sm:$0xff] }
   0xa   :  { %379 = vmatprep.subr.mxu0 %v68_v9  ;;  %181 = vmatprep.mubr.f32.mxu0 %v15_v17  ;;  %v16_v27 = vld [vmem:[%s780_s0 + $0x10] sm:$0xff]  ;;  %v46_v29 = vld [vmem:[%s779_s1 + $0x28] sm:$0xff]  ;;  %v61_v30 = vld [vmem:[%s779_s1 + $0xa0] sm:$0xff] }
   0xb   :  { %380 = vmatpush3.msra.mxu0 %v52_v10  ;;  %449 = vmatpush3.msra.mxu1 %v75_v19  ;;  %v45_v31 = vld [vmem:[%s779_s1 + $0x20] sm:$0xff]  ;;  %v19_v32 = vld [vmem:[%s780_s0 + $0x28] sm:$0xff]  ;;  %v60_v33 = vld [vmem:[%s779_s1 + $0x98] sm:$0xff] }
   0xc   :  { %381 = vmatprep.subr.mxu0 %v67_v11  ;;  %450 = vmatprep.subr.mxu1 %v483_v3  ;;  %v44_v34 = vld [vmem:[%s779_s1 + $0x18] sm:$0xff]  ;;  %v59_v35 = vld [vmem:[%s779_s1 + $0x90] sm:$0xff]  ;;  %v22_v37 = vld [vmem:[%s780_s0 + $0x40] sm:$0xff] }
   0xd   :  { %382 = vmatpush3.msra.mxu0 %v51_v12  ;;  %451 = vmatpush3.msra.mxu1 %v74_v22  ;;  %v43_v36 = vld [vmem:[%s779_s1 + $0x10] sm:$0xff]  ;;  %v58_v38 = vld [vmem:[%s779_s1 + $0x88] sm:$0xff]  ;;  %v57_v40 = vld [vmem:[%s779_s1 + $0x80] sm:$0xff] }
   0xe   :  { %383 = vmatprep.subr.mxu0 %v66_v14  ;;  %452 = vmatprep.subr.mxu1 %v483_v3  ;;  %v42_v39 = vld [vmem:[%s779_s1 + $0x8] sm:$0xff]  ;;  %v41_v41 = vld [vmem:[%s779_s1] sm:$0xff]  ;;  %v25_v42 = vld [vmem:[%s780_s0 + $0x58] sm:$0xff] }
   0xf   :  { %384 = vmatpush3.msra.mxu0 %v50_v16  ;;  %453 = vmatpush3.msra.mxu1 %v73_v25  ;;  %v14_v43 = vld [vmem:[%s780_s0] sm:$0xff]  ;;  %v28_v45 = vld [vmem:[%s780_s0 + $0x70] sm:$0xff]  ;;  %v17_v46 = vld [vmem:[%s780_s0 + $0x18] sm:$0xff] }
  0x10   :  { %385 = vmatprep.subr.mxu0 %v65_v18  ;;  %455 = vmatmul.mubr.msk.f32.vlgmr.msra.gmra.mxu1 %vm85_vm2, %v16_v27  ;;  %v18_v44 = vld [vmem:[%s780_s0 + $0x20] sm:$0xff]  ;;  %v21_v47 = vld [vmem:[%s780_s0 + $0x38] sm:$0xff]  ;;  %v31_v48 = vld [vmem:[%s780_s0 + $0x88] sm:$0xff] }
  0x11   :  { %386 = vmatpush3.msra.mxu0 %v49_v20  ;;  %457 = vmatprep.mubr.msk.f32.mxu1 %vm484_vm0, %v483_v3  ;;  %v20_v49 = vld [vmem:[%s780_s0 + $0x30] sm:$0xff]  ;;  %v34_v51 = vld [vmem:[%s780_s0 + $0xa0] sm:$0xff]  ;;  %v23_v52 = vld [vmem:[%s780_s0 + $0x48] sm:$0xff] }
  0x12   :  { %387 = vmatprep.subr.mxu0 %v64_v21  ;;  %v24_v50 = vld [vmem:[%s780_s0 + $0x50] sm:$0xff]  ;;  %v27_v53 = vld [vmem:[%s780_s0 + $0x68] sm:$0xff]  ;;  %v37_v54 = vld [vmem:[%s780_s0 + $0xb8] sm:$0xff] }
  0x13   :  { %388 = vmatpush3.msra.mxu0 %v48_v23  ;;  %v26_v55 = vld [vmem:[%s780_s0 + $0x60] sm:$0xff]  ;;  %v40_v57 = vld [vmem:[%s780_s0 + $0xd0] sm:$0xff]  ;;  %v29_v58 = vld [vmem:[%s780_s0 + $0x78] sm:$0xff] }
  0x14   :  { %389 = vmatprep.subr.mxu0 %v63_v24  ;;  %458 = vmatmul.mubr.msk.f32.gmra.mxu1 %vm85_vm2, %v19_v32  ;;  %v30_v56 = vld [vmem:[%s780_s0 + $0x80] sm:$0xff]  ;;  %v33_v59 = vld [vmem:[%s780_s0 + $0x98] sm:$0xff]  ;;  %v32_v60 = vld [vmem:[%s780_s0 + $0x90] sm:$0xff] }
  0x15   :  { %390 = vmatpush3.msra.mxu0 %v47_v26  ;;  %460 = vmatprep.mubr.msk.f32.mxu1 %vm484_vm0, %v483_v3  ;;  %v36_v61 = vld [vmem:[%s780_s0 + $0xb0] sm:$0xff]  ;;  %v35_v62 = vld [vmem:[%s780_s0 + $0xa8] sm:$0xff]  ;;  %v38_v0 = vld [vmem:[%s780_s0 + $0xc0] sm:$0xff] }
  0x16   :  { %391 = vmatprep.subr.mxu0 %v62_v28  ;;  %v39_v63 = vld [vmem:[%s780_s0 + $0xc8] sm:$0xff]  ;;  %v732_v11 = vld [vmem:[%s781_s2] ss:$0 sm:$0xff] }
  0x17   :  { %392 = vmatpush3.msra.mxu0 %v46_v29 }
  0x18   :  { %393 = vmatprep.subr.mxu0 %v61_v30  ;;  %461 = vmatmul.mubr.msk.f32.gmra.mxu1 %vm85_vm2, %v22_v37 }
  0x19   :  { %394 = vmatpush3.msra.mxu0 %v45_v31  ;;  %463 = vmatprep.mubr.msk.f32.mxu1 %vm484_vm0, %v483_v3 }
  0x1a   :  { %395 = vmatprep.subr.mxu0 %v60_v33 }
  0x1b   :  { %396 = vmatpush3.msra.mxu0 %v44_v34 }
  0x1c   :  { %397 = vmatprep.subr.mxu0 %v59_v35  ;;  %464 = vmatmul.mubr.msk.f32.gmra.mxu1 %vm85_vm2, %v25_v42 }
  0x1d   :  { %398 = vmatpush3.msra.mxu0 %v43_v36  ;;  %466 = vmatprep.mubr.msk.f32.mxu1 %vm484_vm0, %v483_v3 }
  0x1e   :  { %399 = vmatprep.subr.mxu0 %v58_v38 }
  0x1f   :  { %400 = vmatpush3.msra.mxu0 %v42_v39 }
  0x20   :  { %401 = vmatprep.subr.mxu0 %v57_v40  ;;  %467 = vmatmul.mubr.msk.f32.gmra.mxu1 %vm85_vm2, %v28_v45 }
  0x21   :  { %402 = vmatpush3.msra.mxu0 %v41_v41  ;;  %469 = vmatprep.mubr.msk.f32.mxu1 %vm484_vm0, %v483_v3 }
  0x22   :  { %182 = vmatmul.mubr.f32.vlgmr.msra.gmra.mxu0 %v14_v43 }
  0x23   :  { %186 = vmatprep.mubr.f32.mxu0 %v18_v44 }
  0x24   :  { %470 = vmatmul.mubr.msk.f32.gmra.mxu1 %vm85_vm2, %v31_v48 }
  0x25   :  { %472 = vmatprep.mubr.msk.f32.mxu1 %vm484_vm0, %v483_v3 }
  0x26   :  { %187 = vmatmul.mubr.f32.gmra.mxu0 %v17_v46 }
  0x27   :  { %191 = vmatprep.mubr.f32.mxu0 %v21_v47 }
  0x28   :  { %473 = vmatmul.mubr.msk.f32.gmra.mxu1 %vm85_vm2, %v34_v51 }
  0x29   :  { %475 = vmatprep.mubr.msk.f32.mxu1 %vm484_vm0, %v483_v3 }
  0x2a   :  { %192 = vmatmul.mubr.f32.gmra.mxu0 %v20_v49 }
  0x2b   :  { %196 = vmatprep.mubr.f32.mxu0 %v24_v50 }
  0x2c   :  { %476 = vmatmul.mubr.msk.f32.gmra.mxu1 %vm85_vm2, %v37_v54 }
  0x2d   :  { %478 = vmatprep.mubr.msk.f32.mxu1 %vm484_vm0, %v483_v3 }
  0x2e   :  { %197 = vmatmul.mubr.f32.gmra.mxu0 %v23_v52 }
  0x2f   :  { %201 = vmatprep.mubr.f32.mxu0 %v27_v53 }
  0x30   :  { %479 = vmatmul.mubr.msk.f32.gmra.mxu1 %vm85_vm2, %v40_v57 }
  0x32   :  { %202 = vmatmul.mubr.f32.gmra.mxu0 %v26_v55 }
  0x33   :  { %206 = vmatprep.mubr.f32.mxu0 %v30_v56 }
  0x36   :  { %207 = vmatmul.mubr.f32.gmra.mxu0 %v29_v58 }
  0x37   :  { %211 = vmatprep.mubr.f32.mxu0 %v33_v59 }
  0x3a   :  { %212 = vmatmul.mubr.f32.gmra.mxu0 %v32_v60 }
  0x3b   :  { %216 = vmatprep.mubr.f32.mxu0 %v36_v61 }
  0x3e   :  { %217 = vmatmul.mubr.f32.gmra.mxu0 %v35_v62 }
  0x3f   :  { %221 = vmatprep.mubr.f32.mxu0 %v39_v63 }
  0x42   :  { %222 = vmatmul.mubr.f32.gmra.mxu0 %v38_v0 }
  0xd0   :  { %v293_v1 = vpop.f32.mrf.mxu1 }
  0xd2   :  { %v456_v2 = vpop.f32.mrf.mxu1 }
  0xd4   :  { %v298_v3 = vpop.f32.mrf.mxu1 }
  0xd6   :  { %v459_v4 = vpop.f32.mrf.mxu1 }
  0xd8   :  { %v303_v5 = vpop.f32.mrf.mxu1 }
  0xda   :  { %v462_v6 = vpop.f32.mrf.mxu1 }
  0xdc   :  { %v308_v7 = vpop.f32.mrf.mxu1 }
  0xde   :  { %v465_v9 = vpop.f32.mrf.mxu1 }
  0xe0   :  { %v313_v13 = vpop.f32.mrf.mxu1 }
  0xe2   :  { %v403_v8 = vpop.f32.mrf.mxu0  ;;  %v468_v16 = vpop.f32.mrf.mxu1 }
  0xe4   :  { %v404_v10 = vpop.f32.mrf.mxu0  ;;  %v318_v20 = vpop.f32.mrf.mxu1 }
  0xe5   :  { %v405_v12 = vadd.f32 %v404_v10, %v403_v8 }
  0xe6   :  { %v406_v14 = vpop.f32.mrf.mxu0  ;;  %v471_v24 = vpop.f32.mrf.mxu1 }
  0xe7   :  { %v184_v15 = vadd.f32 %v405_v12, %v732_v11 }
  0xe8   :  { %v407_v17 = vpop.f32.mrf.mxu0  ;;  %v323_v28 = vpop.f32.mrf.mxu1 }
  0xe9   :  { %v294_v18 = vadd.f32 %v293_v1, %v184_v15  ;;  %v408_v19 = vadd.f32 %v407_v17, %v406_v14 }
  0xea   :  { %v409_v21 = vpop.f32.mrf.mxu0  ;;  %v474_v32 = vpop.f32.mrf.mxu1 }
  0xeb   :  { %v337_v22 = vmax.f32 %v294_v18, 0.0  ;;  %v189_v23 = vadd.f32 %v408_v19, %v732_v11 }
  0xec   :  { %v410_v25 = vpop.f32.mrf.mxu0  ;;  %v328_v36 = vpop.f32.mrf.mxu1 }
  0xed   :  { %347 = vst.msk [vmem:[%s782_s3] sm:$0xff] %vm346_vm3, %v337_v22  ;;  %v299_v26 = vadd.f32 %v298_v3, %v189_v23  ;;  %v411_v27 = vadd.f32 %v410_v25, %v409_v21 }
  0xee   :  { %v412_v29 = vpop.f32.mrf.mxu0  ;;  %v477_v40 = vpop.f32.mrf.mxu1 }
  0xef   :  { %v338_v30 = vmax.f32 %v299_v26, 0.0  ;;  %v194_v31 = vadd.f32 %v411_v27, %v732_v11 }
  0xf0   :  { %v413_v33 = vpop.f32.mrf.mxu0  ;;  %v333_v44 = vpop.f32.mrf.mxu1 }
  0xf1   :  { %348 = vst.msk [vmem:[%s782_s3 + $0x8] sm:$0xff] %vm346_vm3, %v338_v30  ;;  %v304_v34 = vadd.f32 %v303_v5, %v194_v31  ;;  %v414_v35 = vadd.f32 %v413_v33, %v412_v29 }
  0xf2   :  { %v415_v37 = vpop.f32.mrf.mxu0  ;;  %v480_v48 = vpop.f32.mrf.mxu1 }
  0xf3   :  { %v339_v38 = vmax.f32 %v304_v34, 0.0  ;;  %v199_v39 = vadd.f32 %v414_v35, %v732_v11 }
  0xf4   :  { %v416_v41 = vpop.f32.mrf.mxu0 }
  0xf5   :  { %349 = vst.msk [vmem:[%s782_s3 + $0x10] sm:$0xff] %vm346_vm3, %v339_v38  ;;  %v309_v42 = vadd.f32 %v308_v7, %v199_v39  ;;  %v417_v43 = vadd.f32 %v416_v41, %v415_v37 }
  0xf6   :  { %v418_v45 = vpop.f32.mrf.mxu0 }
  0xf7   :  { %v340_v46 = vmax.f32 %v309_v42, 0.0  ;;  %v204_v47 = vadd.f32 %v417_v43, %v732_v11 }
  0xf8   :  { %v419_v49 = vpop.f32.mrf.mxu0 }
  0xf9   :  { %350 = vst.msk [vmem:[%s782_s3 + $0x18] sm:$0xff] %vm346_vm3, %v340_v46  ;;  %v314_v50 = vadd.f32 %v313_v13, %v204_v47  ;;  %v420_v51 = vadd.f32 %v419_v49, %v418_v45 }
  0xfa   :  { %v421_v52 = vpop.f32.mrf.mxu0 }
  0xfb   :  { %v341_v53 = vmax.f32 %v314_v50, 0.0  ;;  %v209_v54 = vadd.f32 %v420_v51, %v732_v11 }
  0xfc   :  { %v422_v55 = vpop.f32.mrf.mxu0 }
  0xfd   :  { %351 = vst.msk [vmem:[%s782_s3 + $0x20] sm:$0xff] %vm346_vm3, %v341_v53  ;;  %v319_v56 = vadd.f32 %v318_v20, %v209_v54  ;;  %v423_v57 = vadd.f32 %v422_v55, %v421_v52 }
  0xfe   :  { %v424_v58 = vpop.f32.mrf.mxu0 }
  0xff   :  { %v342_v59 = vmax.f32 %v319_v56, 0.0  ;;  %v214_v60 = vadd.f32 %v423_v57, %v732_v11 }
 0x100   :  { %v425_v61 = vpop.f32.mrf.mxu0 }
 0x101   :  { %352 = vst.msk [vmem:[%s782_s3 + $0x28] sm:$0xff] %vm346_vm3, %v342_v59  ;;  %v324_v62 = vadd.f32 %v323_v28, %v214_v60  ;;  %v426_v63 = vadd.f32 %v425_v61, %v424_v58 }
 0x102   :  { %v427_v0 = vpop.f32.mrf.mxu0 }
 0x103   :  { %v343_v1 = vmax.f32 %v324_v62, 0.0  ;;  %v219_v2 = vadd.f32 %v426_v63, %v732_v11 }
 0x104   :  { %v428_v3 = vpop.f32.mrf.mxu0 }
 0x105   :  { %353 = vst.msk [vmem:[%s782_s3 + $0x30] sm:$0xff] %vm346_vm3, %v343_v1  ;;  %v329_v4 = vadd.f32 %v328_v36, %v219_v2  ;;  %v429_v5 = vadd.f32 %v428_v3, %v427_v0 }
 0x107   :  { %v344_v6 = vmax.f32 %v329_v4, 0.0  ;;  %v224_v7 = vadd.f32 %v429_v5, %v732_v11 }
 0x109   :  { %354 = vst.msk [vmem:[%s782_s3 + $0x38] sm:$0xff] %vm346_vm3, %v344_v6  ;;  %v334_v8 = vadd.f32 %v333_v44, %v224_v7 }
 0x10b   :  { %v345_v9 = vmax.f32 %v334_v8, 0.0 }
 0x10d   :  { %355 = vst.msk [vmem:[%s782_s3 + $0x40] sm:$0xff] %vm346_vm3, %v345_v9 }

</bundles_post_ra>
